<compile_context>
chip_gen: v7x
topology: tpu7x:2x2x1
jax: 0.10.0
libtpu: 0.0.40
codegen_flags: <defaults>
</compile_context>

<pallas_src>
import functools

import jax
import jax.numpy as jnp
from jax.experimental import pallas as pl
from jax.experimental.pallas import tpu as pltpu

_NEG_INF = jnp.float32(-1e30)


def _round_up(x, m):
    return ((x + m - 1) // m) * m


def rnn_seq_kernel(x_ref, h0_ref, wx_ref, wh_ref, b_ref,
                   out_ref, hlast_ref, h_scr, *, H_pad):
    """One RNN timestep per grid iteration; hidden carried in VMEM scratch.

    x_ref     : (1, B_pad, I_pad)       current timestep input (t-indexed block)
    h0_ref    : (B_pad, H_pad)          initial hidden           (resident)
    wx_ref    : (I_pad, H_pad + O_pad)  [Wh_x | Wo_x] packed     (resident)
    wh_ref    : (H_pad, H_pad + O_pad)  [Wh_h | Wo_h] packed     (resident)
    b_ref     : (1,     H_pad + O_pad)  [bh | bo], -1e30 on padded logit lanes
    out_ref   : (1, B_pad, O_pad)       log_softmax(logits) for this timestep
    hlast_ref : (B_pad, H_pad)          hidden after the last timestep
    h_scr     : (B_pad, H_pad) VMEM     hidden carry across grid iterations
    """
    t = pl.program_id(0)

    @pl.when(t == 0)
    def _():
        h_scr[...] = h0_ref[...]

    x = x_ref[0]            # (B_pad, I_pad)
    h = h_scr[...]          # (B_pad, H_pad) -- hidden from previous step

    # Two MXU matmuls replace the cat(x, h) @ W of the reference module; both
    # Linear layers stay fused along N = H_pad + O_pad.
    res = (jnp.dot(x, wx_ref[...], preferred_element_type=jnp.float32)
           + jnp.dot(h, wh_ref[...], preferred_element_type=jnp.float32)
           + b_ref[...])

    hnew = res[:, :H_pad]   # aligned split at the 128 boundary
    h_scr[...] = hnew

    # Numerically-stable log_softmax.  Padded logit lanes already hold ~-1e30
    # via the bias, so they vanish from both the max and the logsumexp.
    logits = res[:, H_pad:]
    m = jnp.max(logits, axis=-1, keepdims=True)
    shifted = logits - m
    lse = jnp.log(jnp.sum(jnp.exp(shifted), axis=-1, keepdims=True))
    out_ref[0] = (shifted - lse).astype(out_ref.dtype)

    @pl.when(t == pl.num_programs(0) - 1)
    def _():
        hlast_ref[...] = hnew.astype(hlast_ref.dtype)


def init_params(key, input_size, hidden_size, output_size):
    """nn.Linear-style U(-1/sqrt(fan_in), 1/sqrt(fan_in)) init, packed & padded.

    The fused weight cat([Wh_t | Wo_t]) is row-split into an x-segment (wx) and
    an h-segment (wh), each lane/sublane padded, so the kernel never needs the
    concatenated activation slab.
    """
    I, H, O = input_size, hidden_size, output_size
    fan_in = I + H
    bound = 1.0 / jnp.sqrt(jnp.float32(fan_in))
    k = jax.random.split(key, 4)
    wh_t = jax.random.uniform(k[0], (fan_in, H), jnp.float32, -bound, bound)
    bh = jax.random.uniform(k[1], (H,), jnp.float32, -bound, bound)
    wo_t = jax.random.uniform(k[2], (fan_in, O), jnp.float32, -bound, bound)
    bo = jax.random.uniform(k[3], (O,), jnp.float32, -bound, bound)

    I_pad = _round_up(I, 128)
    H_pad = _round_up(H, 128)
    O_pad = _round_up(O, 128)
    N = H_pad + O_pad

    wx = jnp.zeros((I_pad, N), jnp.float32)
    wx = wx.at[:I, :H].set(wh_t[:I])
    wx = wx.at[:I, H_pad:H_pad + O].set(wo_t[:I])

    wh = jnp.zeros((H_pad, N), jnp.float32)
    wh = wh.at[:H, :H].set(wh_t[I:])
    wh = wh.at[:H, H_pad:H_pad + O].set(wo_t[I:])

    b_all = jnp.zeros((1, N), jnp.float32)
    b_all = b_all.at[0, :H].set(bh)
    b_all = b_all.at[0, H_pad:H_pad + O].set(bo)
    # Bake the pad-lane mask into the bias (built once, never per step).
    b_all = b_all.at[0, H_pad + O:].set(_NEG_INF)

    dims = dict(I=I, H=H, O=O, I_pad=I_pad, H_pad=H_pad, O_pad=O_pad)
    return wx, wh, b_all, dims


def rnn_forward_sequence(x_seq, h0, params):
    """x_seq: (T, B, I), h0: (B, H) -> (log_probs (T, B, O), h_last (B, H)).

    Semantically identical to looping the PyTorch module's forward() over T
    timesteps, feeding each returned hidden into the next step.
    """
    wx, wh, b_all, dims = params
    T, B, I = x_seq.shape
    H, O = dims["H"], dims["O"]
    I_pad, H_pad, O_pad = dims["I_pad"], dims["H_pad"], dims["O_pad"]
    N = H_pad + O_pad
    B_pad = _round_up(max(B, 8), 8)   # fill f32 sublanes

    # One-time layout plumbing (amortized over the whole sequence).
    x_p = jnp.zeros((T, B_pad, I_pad), jnp.float32)
    x_p = x_p.at[:, :B, :I].set(x_seq.astype(jnp.float32))
    h0_p = jnp.zeros((B_pad, H_pad), jnp.float32)
    h0_p = h0_p.at[:B, :H].set(h0.astype(jnp.float32))

    kernel = functools.partial(rnn_seq_kernel, H_pad=H_pad)

    # Time is inherently sequential -> "arbitrary".  For a large batch on v7x,
    # a leading batch-tile axis marked "parallel" would keep both TensorCores
    # busy; at batch=2 it would only add overhead, so it is omitted here.
    logp_pad, hlast_pad = pl.pallas_call(
        kernel,
        grid=(T,),
        out_shape=(jax.ShapeDtypeStruct((T, B_pad, O_pad), jnp.float32),
                   jax.ShapeDtypeStruct((B_pad, H_pad), jnp.float32)),
        in_specs=[
            pl.BlockSpec((1, B_pad, I_pad), lambda t: (t, 0, 0)),   # per-step x
            pl.BlockSpec((B_pad, H_pad), lambda t: (0, 0)),         # h0 (resident)
            pl.BlockSpec((I_pad, N), lambda t: (0, 0)),             # Wx (resident)
            pl.BlockSpec((H_pad, N), lambda t: (0, 0)),             # Wh (resident)
            pl.BlockSpec((1, N), lambda t: (0, 0)),                 # bias (resident)
        ],
        out_specs=(
            pl.BlockSpec((1, B_pad, O_pad), lambda t: (t, 0, 0)),   # streamed out
            pl.BlockSpec((B_pad, H_pad), lambda t: (0, 0)),         # final hidden
        ),
        scratch_shapes=[pltpu.VMEM((B_pad, H_pad), jnp.float32)],   # hidden carry
        compiler_params=pltpu.CompilerParams(
            dimension_semantics=("arbitrary",)),
    )(x_p, h0_p, wx, wh, b_all)

    return logp_pad[:, :B, :O], hlast_pad[:B, :H]


def rnn_forward(x, h, params):
    """Single-step forward, exactly matching the PyTorch module's forward()."""
    out_seq, h_new = rnn_forward_sequence(x[None], h, params)
    return out_seq[0], h_new


if __name__ == "__main__":
    input_size, hidden_size, output_size = 16, 32, 8
    batch, seq_len = 2, 8

    key = jax.random.PRNGKey(0)
    kp, kx = jax.random.split(key)
    params = init_params(kp, input_size, hidden_size, output_size)

    x_seq = jax.random.normal(kx, (seq_len, batch, input_size), jnp.float32)
    h0 = jnp.zeros((batch, hidden_size), jnp.float32)   # matches hidden_zeros()

    out_seq, h_last = rnn_forward_sequence(x_seq, h0, params)
    out1, h1 = rnn_forward(x_seq[0], h0, params)          # single-step API
    jax.block_until_ready((out_seq, h_last, out1, h1))

    # Plain-JAX reference: recover unpadded weights from the packed slabs and
    # loop the original per-step forward over the sequence.
    wx, wh, b_all, dims = params
    I, H, O, H_pad = dims["I"], dims["H"], dims["O"], dims["H_pad"]
    wh_t = jnp.concatenate([wx[:I, :H], wh[:H, :H]], axis=0)                      # (I+H, H)
    wo_t = jnp.concatenate([wx[:I, H_pad:H_pad + O], wh[:H, H_pad:H_pad + O]], 0)  # (I+H, O)
    bh = b_all[0, :H]
    bo = b_all[0, H_pad:H_pad + O]

    h_ref = h0
    ref_outs = []
    for t in range(seq_len):
        combined = jnp.concatenate([x_seq[t], h_ref], axis=1)
        logits = combined @ wo_t + bo
        ref_outs.append(jax.nn.log_softmax(logits, axis=1))
        h_ref = combined @ wh_t + bh
    ref_out_seq = jnp.stack(ref_outs)

    assert jnp.allclose(out_seq, ref_out_seq, atol=1e-4), "log_softmax sequence mismatch"
    assert jnp.allclose(h_last, h_ref, atol=1e-4), "final hidden mismatch"
    assert jnp.allclose(out1, ref_out_seq[0], atol=1e-4), "single-step output mismatch"

    print("KERNEL_OK")
</pallas_src>

<mosaic_0001>
module attributes {stable_mosaic.version = 11 : i64} {
  func.func @rnn_seq_kernel(%arg0: i32, %arg1: memref<1x8x128xf32, #tpu.memory_space<vmem>>, %arg2: memref<8x128xf32, #tpu.memory_space<vmem>>, %arg3: memref<128x256xf32, #tpu.memory_space<vmem>>, %arg4: memref<128x256xf32, #tpu.memory_space<vmem>>, %arg5: memref<1x256xf32, #tpu.memory_space<vmem>>, %arg6: memref<1x8x128xf32, #tpu.memory_space<vmem>>, %arg7: memref<8x128xf32, #tpu.memory_space<vmem>>, %arg8: memref<8x128xf32, #tpu.memory_space<vmem>>) attributes {dimension_semantics = [#tpu.dimension_semantics<arbitrary>], iteration_bounds = array<i64: 8>, scalar_prefetch = 0 : i64, scratch_operands = 1 : i64, tpu.core_type = #tpu.core_type<tc>, window_params = [{transform_indices = @transform_0, window_bounds = array<i64: 1, 8, 128>}, {pipeline_mode = #tpu.pipeline_mode<synchronous>, transform_indices = @transform_1, window_bounds = array<i64: 8, 128>}, {pipeline_mode = #tpu.pipeline_mode<synchronous>, transform_indices = @transform_2, window_bounds = array<i64: 128, 256>}, {pipeline_mode = #tpu.pipeline_mode<synchronous>, transform_indices = @transform_3, window_bounds = array<i64: 128, 256>}, {pipeline_mode = #tpu.pipeline_mode<synchronous>, transform_indices = @transform_4, window_bounds = array<i64: 1, 256>}, {transform_indices = @transform_5, window_bounds = array<i64: 1, 8, 128>}, {pipeline_mode = #tpu.pipeline_mode<synchronous>, transform_indices = @transform_6, window_bounds = array<i64: 8, 128>}]} {
    %c0_i32 = arith.constant 0 : i32
    %0 = arith.cmpi eq, %arg0, %c0_i32 : i32
    %1 = arith.extui %0 : i1 to i32
    %c0_i32_0 = arith.constant 0 : i32
    %2 = arith.cmpi ne, %1, %c0_i32_0 : i32
    scf.if %2 {
      %c0_20 = arith.constant 0 : index
      %c0_21 = arith.constant 0 : index
      %33 = vector.load %arg2[%c0_20, %c0_21] : memref<8x128xf32, #tpu.memory_space<vmem>>, vector<8x128xf32>
      %c0_22 = arith.constant 0 : index
      %c0_23 = arith.constant 0 : index
      %34 = vector.load %arg8[%c0_22, %c0_23] : memref<8x128xf32, #tpu.memory_space<vmem>>, vector<8x128xf32>
      tpu.vector_store %arg8[%c0_22, %c0_23], %33 {strides = array<i32>} : memref<8x128xf32, #tpu.memory_space<vmem>>, vector<8x128xf32>,
    } else {
    }
    %c0 = arith.constant 0 : index
    %c0_1 = arith.constant 0 : index
    %c0_2 = arith.constant 0 : index
    %3 = vector.load %arg1[%c0, %c0_1, %c0_2] : memref<1x8x128xf32, #tpu.memory_space<vmem>>, vector<1x8x128xf32>
    %4 = vector.shape_cast %3 : vector<1x8x128xf32> to vector<8x128xf32>
    %c0_3 = arith.constant 0 : index
    %c0_4 = arith.constant 0 : index
    %5 = vector.load %arg8[%c0_3, %c0_4] : memref<8x128xf32, #tpu.memory_space<vmem>>, vector<8x128xf32>
    %c0_5 = arith.constant 0 : index
    %c0_6 = arith.constant 0 : index
    %6 = vector.load %arg3[%c0_5, %c0_6] : memref<128x256xf32, #tpu.memory_space<vmem>>, vector<128x256xf32>
    %cst = arith.constant dense<0.000000e+00> : vector<8x256xf32>
    %7 = tpu.matmul %4, %6, %cst {dimension_numbers = #tpu.dot_dimension_numbers<[1], [0], [0], [1], [0, 0, 1, 1], [], []>} : vector<8x128xf32>, vector<128x256xf32>, vector<8x256xf32> -> vector<8x256xf32>
    %c0_7 = arith.constant 0 : index
    %c0_8 = arith.constant 0 : index
    %8 = vector.load %arg4[%c0_7, %c0_8] : memref<128x256xf32, #tpu.memory_space<vmem>>, vector<128x256xf32>
    %cst_9 = arith.constant dense<0.000000e+00> : vector<8x256xf32>
    %9 = tpu.matmul %5, %8, %cst_9 {dimension_numbers = #tpu.dot_dimension_numbers<[1], [0], [0], [1], [0, 0, 1, 1], [], []>} : vector<8x128xf32>, vector<128x256xf32>, vector<8x256xf32> -> vector<8x256xf32>
    %10 = arith.addf %7, %9 : vector<8x256xf32>
    %c0_10 = arith.constant 0 : index
    %c0_11 = arith.constant 0 : index
    %11 = vector.load %arg5[%c0_10, %c0_11] : memref<1x256xf32, #tpu.memory_space<vmem>>, vector<1x256xf32>
    %12 = vector.broadcast %11 : vector<1x256xf32> to vector<8x256xf32>
    %13 = arith.addf %10, %12 : vector<8x256xf32>
    %14 = vector.extract_strided_slice %13 {offsets = [0, 0], sizes = [8, 128], strides = [1, 1]} : vector<8x256xf32> to vector<8x128xf32>
    %c0_12 = arith.constant 0 : index
    %c0_13 = arith.constant 0 : index
    %15 = vector.load %arg8[%c0_12, %c0_13] : memref<8x128xf32, #tpu.memory_space<vmem>>, vector<8x128xf32>
    tpu.vector_store %arg8[%c0_12, %c0_13], %14 {strides = array<i32>} : memref<8x128xf32, #tpu.memory_space<vmem>>, vector<8x128xf32>,
    %16 = vector.extract_strided_slice %13 {offsets = [0, 128], sizes = [8, 128], strides = [1, 1]} : vector<8x256xf32> to vector<8x128xf32>
    %cst_14 = arith.constant dense<0xFF800000> : vector<8xf32>
    %17 = vector.multi_reduction <maximumf>, %16, %cst_14 [1] : vector<8x128xf32> to vector<8xf32>
    %18 = vector.shape_cast %17 : vector<8xf32> to vector<8x1xf32>
    %19 = vector.broadcast %18 : vector<8x1xf32> to vector<8x128xf32>
    %20 = arith.subf %16, %19 : vector<8x128xf32>
    %21 = math.exp %20 : vector<8x128xf32>
    %cst_15 = arith.constant dense<0.000000e+00> : vector<8xf32>
    %22 = vector.multi_reduction <add>, %21, %cst_15 [1] : vector<8x128xf32> to vector<8xf32>
    %23 = vector.shape_cast %22 : vector<8xf32> to vector<8x1xf32>
    %24 = math.log %23 : vector<8x1xf32>
    %25 = vector.broadcast %24 : vector<8x1xf32> to vector<8x128xf32>
    %26 = arith.subf %20, %25 : vector<8x128xf32>
    %c0_16 = arith.constant 0 : index
    %c0_17 = arith.constant 0 : index
    %c0_18 = arith.constant 0 : index
    %27 = vector.load %arg6[%c0_16, %c0_17, %c0_18] : memref<1x8x128xf32, #tpu.memory_space<vmem>>, vector<1x8x128xf32>
    %28 = vector.shape_cast %27 : vector<1x8x128xf32> to vector<8x128xf32>
    %29 = vector.shape_cast %26 : vector<8x128xf32> to vector<1x8x128xf32>
    tpu.vector_store %arg6[%c0_16, %c0_17, %c0_18], %29 {strides = array<i32>} : memref<1x8x128xf32, #tpu.memory_space<vmem>>, vector<1x8x128xf32>,
    %c7_i32 = arith.constant 7 : i32
    %30 = arith.cmpi eq, %arg0, %c7_i32 : i32
    %31 = arith.extui %30 : i1 to i32
    %c0_i32_19 = arith.constant 0 : i32
    %32 = arith.cmpi ne, %31, %c0_i32_19 : i32
    scf.if %32 {
      %c0_20 = arith.constant 0 : index
      %c0_21 = arith.constant 0 : index
      %33 = vector.load %arg7[%c0_20, %c0_21] : memref<8x128xf32, #tpu.memory_space<vmem>>, vector<8x128xf32>
      tpu.vector_store %arg7[%c0_20, %c0_21], %14 {strides = array<i32>} : memref<8x128xf32, #tpu.memory_space<vmem>>, vector<8x128xf32>,
    } else {
    }
    return
  }
  func.func @transform_0(%arg0: i32) -> (i32, i32, i32) {
    %c0_i32 = arith.constant 0 : i32
    %c0_i32_0 = arith.constant 0 : i32
    %c0_i32_1 = arith.constant 0 : i32
    return %arg0, %c0_i32, %c0_i32_0 : i32, i32, i32
  }
  func.func @transform_1(%arg0: i32) -> (i32, i32) {
    %c0_i32 = arith.constant 0 : i32
    %c0_i32_0 = arith.constant 0 : i32
    %c0_i32_1 = arith.constant 0 : i32
    return %c0_i32, %c0_i32_0 : i32, i32
  }
  func.func @transform_2(%arg0: i32) -> (i32, i32) {
    %c0_i32 = arith.constant 0 : i32
    %c0_i32_0 = arith.constant 0 : i32
    %c0_i32_1 = arith.constant 0 : i32
    return %c0_i32, %c0_i32_0 : i32, i32
  }
  func.func @transform_3(%arg0: i32) -> (i32, i32) {
    %c0_i32 = arith.constant 0 : i32
    %c0_i32_0 = arith.constant 0 : i32
    %c0_i32_1 = arith.constant 0 : i32
    return %c0_i32, %c0_i32_0 : i32, i32
  }
  func.func @transform_4(%arg0: i32) -> (i32, i32) {
    %c0_i32 = arith.constant 0 : i32
    %c0_i32_0 = arith.constant 0 : i32
    %c0_i32_1 = arith.constant 0 : i32
    return %c0_i32, %c0_i32_0 : i32, i32
  }
  func.func @transform_5(%arg0: i32) -> (i32, i32, i32) {
    %c0_i32 = arith.constant 0 : i32
    %c0_i32_0 = arith.constant 0 : i32
    %c0_i32_1 = arith.constant 0 : i32
    return %arg0, %c0_i32, %c0_i32_0 : i32, i32, i32
  }
  func.func @transform_6(%arg0: i32) -> (i32, i32) {
    %c0_i32 = arith.constant 0 : i32
    %c0_i32_0 = arith.constant 0 : i32
    %c0_i32_1 = arith.constant 0 : i32
    return %c0_i32, %c0_i32_0 : i32, i32
  }
}

</mosaic_0001>

<bundles_post_ra>
// kernel: tpu_custom_call.1
= control target key start
LH: loop header
LB: loop body
LE: loop exit
PB: predicated region body
PF: predicated region fallthrough
CT: control target
= control target key end

     0   :  { %12 = vsyncpa [#allocation4], 0  ;;  %s1406_s0 = inlined_call_operand.hbm [shape: f32[8,8,128], index: 0, kind: input, shape index: {}]   ;;  %s1407_s1 = inlined_call_operand.hbm [shape: f32[8,128], index: 1, kind: input, shape index: {}]   ;;  %s1408_s2 = inlined_call_operand.hbm [shape: f32[128,256], index: 2, kind: input, shape index: {}]   ;;  %s1409_s3 = inlined_call_operand.hbm [shape: f32[128,256], index: 3, kind: input, shape index: {}]   ;;  %s1410_s4 = inlined_call_operand.vmem [shape: f32[1,256], index: 4, kind: input, shape index: {}]   ;;  %s1411_s5 = inlined_call_operand.hbm [shape: f32[8,8,128], index: 5, kind: output, shape index: {0}]   ;;  %s1412_s6 = inlined_call_operand.hbm [shape: f32[8,128], index: 6, kind: output, shape index: {1}]  }
   0x1   :  { %14 = vsyncpa [#allocation4 + $0x1], 0 }
   0x2   :  { %15 = vsyncpa [#allocation7], 0 }
   0x3   :  { %16 = vsyncpa [#allocation10], 0 }
   0x4   :  { %17 = vsyncpa [#allocation5], 0 }
   0x5   :  { %19 = vsyncpa [#allocation5 + $0x1], 0 }
   0x6   :  { %20 = vsyncpa [#allocation13], 0  ;;  %s1131_s21 = smov 0   ;;  %s1133_s22 = smov 0  }
   0x7   :  { %s1135_s23 = smov 0   ;;  %s1137_s24 = smov 0  }
   0x8 LB: > { %s1152_s25 = sadd.s32 4294967295, %s1085_s24   ;;  %s688_s26 = sadd.s32 4294967294, %s1085_s24   ;;  %s1085_s24 = sphi %s1137_s24, %s1440_s24   ;;  %s1081_s23 = sphi %s1135_s23, %s1439_s23   ;;  %s1077_s22 = sphi %s1133_s22, %s1438_s22   ;;  %s1073_s21 = sphi %s1131_s21, %s1437_s21  }
   0x9   : > { %p46_p0 = scmp.ne.s32.totalorder %s1077_s22, %s1073_s21  ;;  %p1413_p1 = scmp.eq.s32.totalorder %s1152_s25, 0 }
   0xa   : > { %p160_p3 = scmp.eq.s32.totalorder %s688_s26, 7  ;;  %p689_p5 = scmp.ge.s32.totalorder %s1085_s24, 1 }
   0xb   : > { %p1161_p4 = por %p1413_p1, %p46_p0  ;;  %p188_p7 = scmp.lt.s32.totalorder %s1085_s24, 9 }
   0xc   : > { %p1166_p6 = por %p160_p3, %p46_p0  ;;  %s1087_s30 = smov [#allocation6]  }
   0xd   : > { %s1416_s27 = scalar_select %p1161_p4, 1, 0 }
   0xe   : > { %s1417_s28 = scalar_select %p1166_p6, 1, 0 }
   0xf   : > { %p1172_p9 = pnand %p689_p5, %p188_p7  ;;  %s201_s7 = sshll.u32 %s1087_s30, 4  ;;  %s202_s7 = int_to_ptr.vmem [resolvable:$true] %s201_s7 }
  0x10   : > { %s1088_s8 = smov [#allocation8]   ;;  %s1089_s11 = smov [#allocation9]  }
  0x11   : > { %s1418_s29 = scalar_select %p1172_p9, 1, 0 }
  0x12   : > { %p796_p10 = pneg %p1172_p9  ;;  %s211_s9 = sshll.u32 %s1088_s8, 4  ;;  %s1184_s9 = int_to_ptr.vmem [resolvable:$true] %s211_s9 }
  0x13   : > { %s1186_s12 = sshll.u32 %s1089_s11, 4  ;;  %s867_s15 = scalar_lea.hbm %s1407_s1, 128  ;;  %s225_s12 = int_to_ptr.vmem [resolvable:$true] %s1186_s12 }
  0x14   : > { %p1180_p11 = pnand %p796_p10, %p1413_p1  ;;  %p868_p12 = scmp.ne.s32.totalorder %s1407_s1, %s867_s15 }
  0x15   : > { %p874_p5 = scmp.lt.u32.totalorder %s867_s15, %s1407_s1 }
  0x16   : > { %p1196_p13 = pneg %p1180_p11 }
  0x18   : > { %p870_p0 = pnand %p1196_p13, %p868_p12 }
  0x1a   : > { %p871_p3 = pneg %p870_p0 }
  0x1c   : > { %p876_p7 = pnand %p874_p5, %p871_p3 }
  0x1e   : > { %879 = shalt.err (!%p876_p7)
}
  0x1f   : > { %s880_s26 = scalar_lea.vmem %s202_s7, 128  ;;  %p888_p2 = scmp.lt.s32.totalorder %s202_s7, %s202_s7 }
  0x20   : > { %p881_p10 = scmp.ne.s32.totalorder %s202_s7, %s880_s26  ;;  %p889_p6 = scmp.lt.s32.totalorder %s880_s26, %s880_s26 }
  0x22   : > { %p883_p8 = pnand %p881_p10, %p1196_p13  ;;  %p890_p4 = por %p889_p6, %p888_p2 }
  0x24   : > { %p884_p1 = pneg %p883_p8 }
  0x26   : > { %p891_p9 = pnand %p890_p4, %p884_p1 }
  0x28   : > { %894 = shalt.err (!%p891_p9)
}
  0x29   : > { %799 = dma.hbm_to_vmem [thread:$0]  (!%p1180_p11), %s1407_s1, 128, %s202_s7, [#allocation7]  }
  0x2a   : > { %s895_s14 = scalar_lea.hbm %s1408_s2, 4096 }
  0x2b   : > { %p896_p8 = scmp.ne.s32.totalorder %s1408_s2, %s895_s14  ;;  %p902_p1 = scmp.lt.u32.totalorder %s895_s14, %s1408_s2 }
  0x2d   : > { %p898_p12 = pnand %p896_p8, %p1196_p13 }
  0x2f   : > { %p899_p2 = pneg %p898_p12 }
  0x31   : > { %p904_p4 = pnand %p902_p1, %p899_p2 }
  0x33   : > { %907 = shalt.err (!%p904_p4)
}
  0x34   : > { %s908_s7 = scalar_lea.vmem %s1184_s9, 4096  ;;  %p916_p3 = scmp.lt.s32.totalorder %s1184_s9, %s1184_s9 }
  0x35   : > { %p909_p6 = scmp.ne.s32.totalorder %s1184_s9, %s908_s7  ;;  %p917_p5 = scmp.lt.s32.totalorder %s908_s7, %s908_s7 }
  0x37   : > { %p911_p9 = pnand %p909_p6, %p1196_p13  ;;  %p918_p7 = por %p917_p5, %p916_p3 }
  0x39   : > { %p912_p0 = pneg %p911_p9 }
  0x3b   : > { %p919_p10 = pnand %p918_p7, %p912_p0 }
  0x3d   : > { %922 = shalt.err (!%p919_p10)
}
  0x3e   : > { %s1090_s20 = smov 256   ;;  %s1091_s26 = smov 16  }
  0x3f   : > { %802 = dma.hbm_to_vmem [thread:$0]  (!%p1180_p11), %s1408_s2, 4096, %s1184_s9, [#allocation7], %s1090_s20, %s1090_s20, %s1091_s26  }
  0x40   : > { %s923_s14 = scalar_lea.hbm %s1409_s3, 4096 }
  0x41   : > { %p924_p8 = scmp.ne.s32.totalorder %s1409_s3, %s923_s14  ;;  %p930_p1 = scmp.lt.u32.totalorder %s923_s14, %s1409_s3 }
  0x43   : > { %p926_p12 = pnand %p924_p8, %p1196_p13 }
  0x45   : > { %p927_p2 = pneg %p926_p12 }
  0x47   : > { %p932_p4 = pnand %p930_p1, %p927_p2 }
  0x49   : > { %935 = shalt.err (!%p932_p4)
}
  0x4a   : > { %s936_s7 = scalar_lea.vmem %s225_s12, 4096  ;;  %p944_p3 = scmp.lt.s32.totalorder %s225_s12, %s225_s12 }
  0x4b   : > { %p937_p6 = scmp.ne.s32.totalorder %s225_s12, %s936_s7  ;;  %p945_p5 = scmp.lt.s32.totalorder %s936_s7, %s936_s7 }
  0x4d   : > { %p939_p9 = pnand %p937_p6, %p1196_p13  ;;  %p946_p7 = por %p945_p5, %p944_p3 }
  0x4f   : > { %p940_p0 = pneg %p939_p9 }
  0x51   : > { %p947_p10 = pnand %p946_p7, %p940_p0 }
  0x53   : > { %950 = shalt.err (!%p947_p10)
}
  0x54   : > { %805 = dma.hbm_to_vmem [thread:$0]  (!%p1180_p11), %s1409_s3, 4096, %s225_s12, [#allocation10], %s1090_s20, %s1090_s20, %s1091_s26  }
  0x55   : > { %s1255_s18 = sadd.s32 1, %s1085_s24   ;;  %s33_s10 = sadd.s32 1, %s1081_s23 }
  0x56   : > { %s30_s8 = ssub.s32 %s1085_s24, %s1255_s18  ;;  %p40_p8 = scmp.ne.s32.totalorder %s1081_s23, %s1077_s22 }
  0x57   : > { %p31_p13 = scmp.eq.s32.totalorder %s30_s8, 0  ;;  %p41_p12 = scmp.eq.s32.totalorder %s1085_s24, 0 }
  0x58   : > { %p817_p2 = scmp.lt.s32.totalorder %s1085_s24, 8  ;;  %p1421_p4 = scmp.eq.s32.totalorder %s1152_s25, 7 }
  0x59   : > { %s1265_s11 = scalar_select %p31_p13, %s1081_s23, %s33_s10  }
  0x5a   : > { %p42_p1 = por %p41_p12, %p40_p8  ;;  %p1269_p6 = por %p1421_p4, %p40_p8 }
  0x5b   : > { %s241_s14 = sand.u32 1, %s1081_s23   ;;  %s695_s15 = sshll.u32 %s1085_s24, 7 }
  0x5c   : > { %s694_s12 = sshll.u32 %s241_s14, 3  ;;  %s1278_s16 = scalar_lea.hbm %s1406_s0, %s695_s15 }
  0x5d   : > { %s245_s17 = scalar_lea.vmem [#allocation3], %s694_s12  ;;  %p1280_p11 = pnand %p817_p2, %p42_p1 }
  0x5e   : > { %s252_s19 = sshll.u32 %s245_s17, 4  ;;  %s242_s9 = scalar_lea.sflag [#allocation4], %s241_s14  ;;  %s1284_s19 = int_to_ptr.vmem [resolvable:$true] %s252_s19 }
  0x5f   : > { %s951_s30 = scalar_lea.hbm %s1278_s16, 128  ;;  %p953_p0 = pneg %p1280_p11 }
  0x60   : > { %p952_p9 = scmp.ne.s32.totalorder %s1278_s16, %s951_s30  ;;  %s956_s15 = scalar_lea.hbm %s1406_s0, 1024 }
  0x61   : > { %p957_p7 = scmp.lt.u32.totalorder %s1278_s16, %s1406_s0  ;;  %p958_p10 = scmp.lt.u32.totalorder %s956_s15, %s951_s30 }
  0x62   : > { %p954_p3 = pnand %p953_p0, %p952_p9  ;;  %p960_p8 = scmp.lt.u32.totalorder %s951_s30, %s1278_s16 }
  0x63   : > { %p959_p13 = por %p958_p10, %p957_p7 }
  0x64   : > { %p955_p5 = pneg %p954_p3 }
  0x65   : > { %p961_p12 = por %p960_p8, %p959_p13 }
  0x67   : > { %p962_p2 = pnand %p961_p12, %p955_p5 }
  0x69   : > { %965 = shalt.err (!%p962_p2)
}
  0x6a   : > { %s966_s14 = scalar_lea.vmem %s1284_s19, 128  ;;  %s1092_s26 = smov [#allocation3]  }
  0x6b   : > { %p967_p1 = scmp.ne.s32.totalorder %s1284_s19, %s966_s14  ;;  %s971_s17 = sshll.u32 %s1092_s26, 4  ;;  %s972_s17 = int_to_ptr.vmem [resolvable:$false] %s971_s17 }
  0x6c   : > { %s973_s8 = scalar_lea.vmem %s972_s17, 256  ;;  %p974_p3 = scmp.lt.s32.totalorder %s1284_s19, %s972_s17 }
  0x6d   : > { %p969_p4 = pnand %p967_p1, %p953_p0  ;;  %p975_p7 = scmp.lt.s32.totalorder %s973_s8, %s966_s14 }
  0x6f   : > { %p970_p9 = pneg %p969_p4  ;;  %p976_p10 = por %p975_p7, %p974_p3 }
  0x71   : > { %p977_p13 = pnand %p976_p10, %p970_p9 }
  0x73   : > { %980 = shalt.err (!%p977_p13)
}
  0x74   : > { %809 = dma.hbm_to_vmem [thread:$0]  (!%p1280_p11), %s1278_s16, 128, %s1284_s19, %s242_s9  }
  0x75   : > { %p1424_p5 = scmp.ne.s32.totalorder %s1418_s29, 0 }
  0x76   : > { %s1314_s30 = sand.u32 (!%p1424_p5), 1, %s1077_s22   ;;  %p1425_p0 = scmp.ne.s32.totalorder (!%p1424_p5), %s1416_s27, 0 }
  0x77   : > { %261 = sbr.rel (%p1424_p5) target bundleno = 764 (0x2fc), region = 40  ;;  %s697_s10 = sshll.u32 (!%p1424_p5), %s1314_s30, 3 }
  0x78   : > { %s264_s15 = scalar_lea.sflag (!%p1424_p5), [#allocation4], %s1314_s30  ;;  %s1318_s12 = scalar_lea.vmem (!%p1424_p5), [#allocation3], %s697_s10 }
  0x7e   : > { %1052 = dma.done.wait (%p1425_p0), %s264_s15, 128  }
  0x7f   : > { %1054 = vsyncadd (%p1425_p0), %s264_s15, 4294967168  ;;  %p1426_p11 = scmp.eq.s32.totalorder %s1152_s25, 0 }
  0x81   : > { %1056 = dma.done.wait (%p1426_p11), [#allocation7], 4224   ;;  %p1427_p8 = pmov %p1426_p11 }
  0x83   : > { %1058 = vsyncadd (%p1427_p8), [#allocation7], 4294963072  ;;  %p1428_p12 = pmov %p1427_p8 }
  0x84   : > { %p1429_p2 = pmov %p1427_p8 }
  0x85   : > { %1060 = dma.done.wait (%p1428_p12), [#allocation10], 4096  }
  0x86   : > { %1062 = vsyncadd (%p1429_p2), [#allocation10], 4294963200  ;;  %s1332_s29 = scalar_lea.vmem [#allocation11], %s697_s10  ;;  %p1430_p1 = scmp.ne.s32.totalorder %s1152_s25, 0 }
  0x87   : > { %v312_v0 = vld [vmem:[#allocation6] sm:$0xff] (!%p1430_p1) }
  0x88   : > { %311 = sbr.rel (%p1430_p1) target bundleno = 143 (0x8f), region = 60  ;;  %313 = vst [vmem:[#allocation2] sm:$0xff] (!%p1430_p1), %v312_v0 }
  0x8f PF: > { %v349_v1 = vld [vmem:[#allocation9 + $0x8] sm:$0xff]  ;;  %v351_v2 = vld [vmem:[#allocation9 + $0x18] sm:$0xff]  ;;  %v348_v6 = vld [vmem:[#allocation9] sm:$0xff]  ;;  %v1093_v8 = vmov 0.0   ;;  %p703_p4 = scmp.ne.s32.totalorder %s1152_s25, 7 }
  0x90   : > { %v317_v3 = vld [vmem:[#allocation8 + $0x8] sm:$0xff]  ;;  %v710_v4 = vpack.c.bf16 %v351_v2, %v349_v1  ;;  %v319_v5 = vld [vmem:[#allocation8 + $0x18] sm:$0xff]  ;;  %v350_v7 = vld [vmem:[#allocation9 + $0x10] sm:$0xff]  ;;  %444 = vmatprep.mubr.f32.mxu1 %v1093_v8  ;;  %515 = vmatprep.mubr.f32.mxu0 %v1093_v8 }
  0x91   : > { %v742_v9 = vpack.c.bf16 %v319_v5, %v317_v3  ;;  %v712_v10 = vpack.c.bf16 %v350_v7, %v348_v6  ;;  %v316_v11 = vld [vmem:[#allocation8] sm:$0xff]  ;;  %v318_v12 = vld [vmem:[#allocation8 + $0x10] sm:$0xff]  ;;  %v353_v13 = vld [vmem:[#allocation9 + $0x28] sm:$0xff] }
  0x92   : > { %711 = vmatprep.subr.bf16.mxu1 %v710_v4  ;;  %v744_v14 = vpack.c.bf16 %v318_v12, %v316_v11  ;;  %v355_v15 = vld [vmem:[#allocation9 + $0x38] sm:$0xff]  ;;  %v321_v16 = vld [vmem:[#allocation8 + $0x28] sm:$0xff]  ;;  %v352_v20 = vld [vmem:[#allocation9 + $0x20] sm:$0xff] }
  0x93   : > { %v323_v17 = vld [vmem:[#allocation8 + $0x38] sm:$0xff]  ;;  %743 = vmatprep.subr.bf16.mxu0 %v742_v9  ;;  %713 = vmatpush1.bf16.msra.mxu1 %v712_v10  ;;  %v714_v18 = vpack.c.bf16 %v355_v15, %v353_v13  ;;  %v354_v21 = vld [vmem:[#allocation9 + $0x30] sm:$0xff]  ;;  %v320_v22 = vld [vmem:[#allocation8 + $0x20] sm:$0xff] }
  0x94   : > { %v746_v19 = vpack.c.bf16 %v323_v17, %v321_v16  ;;  %745 = vmatpush1.bf16.msra.mxu0 %v744_v14  ;;  %v716_v23 = vpack.c.bf16 %v354_v21, %v352_v20  ;;  %v322_v24 = vld [vmem:[#allocation8 + $0x30] sm:$0xff]  ;;  %v357_v25 = vld [vmem:[#allocation9 + $0x48] sm:$0xff]  ;;  %v359_v26 = vld [vmem:[#allocation9 + $0x58] sm:$0xff] }
  0x95   : > { %715 = vmatprep.subr.bf16.mxu1 %v714_v18  ;;  %v748_v27 = vpack.c.bf16 %v322_v24, %v320_v22  ;;  %v718_v28 = vpack.c.bf16 %v359_v26, %v357_v25  ;;  %v325_v29 = vld [vmem:[#allocation8 + $0x48] sm:$0xff]  ;;  %v327_v30 = vld [vmem:[#allocation8 + $0x58] sm:$0xff]  ;;  %v356_v31 = vld [vmem:[#allocation9 + $0x40] sm:$0xff] }
  0x96   : > { %747 = vmatprep.subr.bf16.mxu0 %v746_v19  ;;  %v750_v32 = vpack.c.bf16 %v327_v30, %v325_v29  ;;  %v358_v33 = vld [vmem:[#allocation9 + $0x50] sm:$0xff]  ;;  %v324_v34 = vld [vmem:[#allocation8 + $0x40] sm:$0xff]  ;;  %v361_v37 = vld [vmem:[#allocation9 + $0x68] sm:$0xff] }
  0x97   : > { %v326_v35 = vld [vmem:[#allocation8 + $0x50] sm:$0xff]  ;;  %717 = vmatpush1.bf16.msra.mxu1 %v716_v23  ;;  %v720_v36 = vpack.c.bf16 %v358_v33, %v356_v31  ;;  %v363_v38 = vld [vmem:[#allocation9 + $0x78] sm:$0xff]  ;;  %v329_v39 = vld [vmem:[#allocation8 + $0x68] sm:$0xff] }
  0x98   : > { %749 = vmatpush1.bf16.msra.mxu0 %v748_v27  ;;  %719 = vmatprep.subr.bf16.mxu1 %v718_v28  ;;  %v752_v40 = vpack.c.bf16 %v326_v35, %v324_v34  ;;  %v722_v41 = vpack.c.bf16 %v363_v38, %v361_v37  ;;  %v331_v42 = vld [vmem:[#allocation8 + $0x78] sm:$0xff]  ;;  %v360_v43 = vld [vmem:[#allocation9 + $0x60] sm:$0xff]  ;;  %v362_v44 = vld [vmem:[#allocation9 + $0x70] sm:$0xff] }
  0x99   : > { %751 = vmatprep.subr.bf16.mxu0 %v750_v32  ;;  %v754_v45 = vpack.c.bf16 %v331_v42, %v329_v39  ;;  %v328_v46 = vld [vmem:[#allocation8 + $0x60] sm:$0xff]  ;;  %v330_v47 = vld [vmem:[#allocation8 + $0x70] sm:$0xff]  ;;  %v365_v48 = vld [vmem:[#allocation9 + $0x88] sm:$0xff]  ;;  %v724_v52 = vpack.c.bf16 %v362_v44, %v360_v43 }
  0x9a   : > { %v367_v49 = vld [vmem:[#allocation9 + $0x98] sm:$0xff]  ;;  %v333_v50 = vld [vmem:[#allocation8 + $0x88] sm:$0xff]  ;;  %v756_v53 = vpack.c.bf16 %v330_v47, %v328_v46  ;;  %v364_v55 = vld [vmem:[#allocation9 + $0x80] sm:$0xff] }
  0x9b   : > { %v335_v51 = vld [vmem:[#allocation8 + $0x98] sm:$0xff]  ;;  %721 = vmatpush1.bf16.msra.mxu1 %v720_v36  ;;  %v726_v54 = vpack.c.bf16 %v367_v49, %v365_v48  ;;  %v366_v56 = vld [vmem:[#allocation9 + $0x90] sm:$0xff]  ;;  %v332_v57 = vld [vmem:[#allocation8 + $0x80] sm:$0xff]  ;;  %v524_v36 = vlaneseq }
  0x9c   : > { %753 = vmatpush1.bf16.msra.mxu0 %v752_v40  ;;  %723 = vmatprep.subr.bf16.mxu1 %v722_v41  ;;  %v758_v58 = vpack.c.bf16 %v335_v51, %v333_v50  ;;  %v334_v59 = vld [vmem:[#allocation8 + $0x90] sm:$0xff]  ;;  %v369_v60 = vld [vmem:[#allocation9 + $0xa8] sm:$0xff]  ;;  %v371_v61 = vld [vmem:[#allocation9 + $0xb8] sm:$0xff]  ;;  %v728_v0 = vpack.c.bf16 %v366_v56, %v364_v55 }
  0x9d   : > { %755 = vmatprep.subr.bf16.mxu0 %v754_v45  ;;  %v337_v62 = vld [vmem:[#allocation8 + $0xa8] sm:$0xff]  ;;  %v339_v63 = vld [vmem:[#allocation8 + $0xb8] sm:$0xff]  ;;  %v760_v1 = vpack.c.bf16 %v334_v59, %v332_v57  ;;  %v730_v2 = vpack.c.bf16 %v371_v61, %v369_v60  ;;  %v368_v3 = vld [vmem:[#allocation9 + $0xa0] sm:$0xff]  ;;  %v525_v37 = vshrl.u32 %v524_v36, 7 }
  0x9e   : > { %v370_v4 = vld [vmem:[#allocation9 + $0xb0] sm:$0xff]  ;;  %v336_v5 = vld [vmem:[#allocation8 + $0xa0] sm:$0xff]  ;;  %v762_v6 = vpack.c.bf16 %v339_v63, %v337_v62  ;;  %v373_v8 = vld [vmem:[#allocation9 + $0xc8] sm:$0xff] }
  0x9f   : > { %725 = vmatpush1.bf16.msra.mxu1 %v724_v52  ;;  %v338_v7 = vld [vmem:[#allocation8 + $0xb0] sm:$0xff]  ;;  %v375_v9 = vld [vmem:[#allocation9 + $0xd8] sm:$0xff]  ;;  %v341_v10 = vld [vmem:[#allocation8 + $0xc8] sm:$0xff]  ;;  %v732_v12 = vpack.c.bf16 %v370_v4, %v368_v3  ;;  %v526_v38 = vsub.s32 0, %v525_v37  ;;  %v530_v40 = vsub.s32 1, %v525_v37 }
  0xa0   : > { %757 = vmatpush1.bf16.msra.mxu0 %v756_v53  ;;  %727 = vmatprep.subr.bf16.mxu1 %v726_v54  ;;  %v343_v11 = vld [vmem:[#allocation8 + $0xd8] sm:$0xff]  ;;  %v764_v13 = vpack.c.bf16 %v338_v7, %v336_v5  ;;  %v734_v14 = vpack.c.bf16 %v375_v9, %v373_v8  ;;  %v372_v15 = vld [vmem:[#allocation9 + $0xc0] sm:$0xff]  ;;  %v374_v16 = vld [vmem:[#allocation9 + $0xd0] sm:$0xff] }
  0xa1   : > { %759 = vmatprep.subr.bf16.mxu0 %v758_v58  ;;  %v340_v17 = vld [vmem:[#allocation8 + $0xc0] sm:$0xff]  ;;  %v766_v18 = vpack.c.bf16 %v343_v11, %v341_v10  ;;  %v342_v19 = vld [vmem:[#allocation8 + $0xd0] sm:$0xff]  ;;  %v377_v20 = vld [vmem:[#allocation9 + $0xe8] sm:$0xff]  ;;  %v736_v24 = vpack.c.bf16 %v374_v16, %v372_v15 }
  0xa2   : > { %v379_v21 = vld [vmem:[#allocation9 + $0xf8] sm:$0xff]  ;;  %v345_v22 = vld [vmem:[#allocation8 + $0xe8] sm:$0xff]  ;;  %v768_v25 = vpack.c.bf16 %v342_v19, %v340_v17  ;;  %v376_v27 = vld [vmem:[#allocation9 + $0xe0] sm:$0xff] }
  0xa3   : > { %729 = vmatpush1.bf16.msra.mxu1 %v728_v0  ;;  %v347_v23 = vld [vmem:[#allocation8 + $0xf8] sm:$0xff]  ;;  %v738_v26 = vpack.c.bf16 %v379_v21, %v377_v20  ;;  %v378_v28 = vld [vmem:[#allocation9 + $0xf0] sm:$0xff]  ;;  %v344_v30 = vld [vmem:[#allocation8 + $0xe0] sm:$0xff] }
  0xa4   : > { %761 = vmatpush1.bf16.msra.mxu0 %v760_v1  ;;  %731 = vmatprep.subr.bf16.mxu1 %v730_v2  ;;  %v770_v29 = vpack.c.bf16 %v347_v23, %v345_v22  ;;  %v346_v31 = vld [vmem:[#allocation8 + $0xf0] sm:$0xff]  ;;  %v740_v32 = vpack.c.bf16 %v378_v28, %v376_v27  ;;  %v315_v34 = vld [vmem:[#allocation2] sm:$0xff] }
  0xa5   : > { %763 = vmatprep.subr.bf16.mxu0 %v762_v6  ;;  %v772_v33 = vpack.c.bf16 %v346_v31, %v344_v30  ;;  %v314_v35 = vld [vmem:[%s1318_s12] sm:$0xff]  ;;  %v522_v39 = vld [vmem:[%s1410_s4] sm:$0x3] }
  0xa6   : > { %v527_v42 = vrot.slane %v522_v39, %v526_v38  ;;  %v531_v45 = vrot.slane %v522_v39, %v530_v40 }
  0xa7   : > { %733 = vmatpush1.bf16.msra.mxu1 %v732_v12 }
  0xa8   : > { %765 = vmatpush1.bf16.msra.mxu0 %v764_v13  ;;  %735 = vmatprep.subr.bf16.mxu1 %v734_v14 }
  0xa9   : > { %767 = vmatprep.subr.bf16.mxu0 %v766_v18 }
  0xab   : > { %737 = vmatpush1.bf16.msra.mxu1 %v736_v24 }
  0xac   : > { %769 = vmatpush1.bf16.msra.mxu0 %v768_v25  ;;  %739 = vmatprep.subr.bf16.mxu1 %v738_v26 }
  0xad   : > { %771 = vmatprep.subr.bf16.mxu0 %v770_v29 }
  0xaf   : > { %741 = vmatpush1.bf16.msra.mxu1 %v740_v32 }
  0xb0   : > { %773 = vmatpush1.bf16.msra.mxu0 %v772_v33 }
  0xb2   : > { %445 = vmatmul.mubr.f32.vlgmr.msra.gmra.mrb[0].mxu1 %v315_v34 }
  0xb3   : > { %516 = vmatmul.mubr.f32.vlgmr.msra.gmra.mrb[0].mxu0 %v314_v35 }
 0x185   : > { %v446_v41 = vpop.f32.mrb[0].mxu1 }
 0x186   : > { %v517_v43 = vpop.f32.mrb[0].mxu0  ;;  %v448_v44 = vpop.f32.mrb[1].mxu1 }
 0x187   : > { %v518_v46 = vadd.f32 %v517_v43, %v446_v41  ;;  %v519_v47 = vpop.f32.mrb[1].mxu0 }
 0x188   : > { %v520_v48 = vadd.f32 %v519_v47, %v448_v44 }
 0x189   : > { %v534_v49 = vadd.f32 %v527_v42, %v518_v46 }
 0x18a   : > { %v535_v50 = vadd.f32 %v531_v45, %v520_v48 }
 0x18b   : > { %536 = vst [vmem:[#allocation2] sm:$0xff] %v534_v49  ;;  %552 = vst [vmem:[#allocation12] sm:$0xff] (!%p703_p4), %v534_v49 }
 0x18c   : > { %537 = vmax.xlane.f32.xlu0 %v535_v50 }
 0x219   : > { %v538_v51 = vpop.xlane.xlu0 %537 }
 0x21a   : > { %v539_v52 = vsub.f32 %v535_v50, %v538_v51 }
 0x21c   : > { %v540_v53 = vmul.f32 1.442695, %v539_v52 }
 0x21e   : > { %863 = vpow2.f32 %v540_v53 }
 0x228   : > { %v864_v54 = vpop.eup %863 }
 0x229   : > { %542 = vadd.xlane.f32.xlu0 %v864_v54 }
 0x2b6   : > { %v543_v55 = vpop.xlane.xlu0 %542 }
 0x2b7   : > { %865 = vlog2.f32 %v543_v55 }
 0x2c0   : > { %551 = sbr.rel (%p703_p4) target bundleno = 711 (0x2c7), region = 64 }
 0x2c1   : > { %v866_v56 = vpop.eup %865 }
 0x2c2   : > { %v545_v57 = vmul.f32 0.6931472, %v866_v56 }
 0x2c4   : > { %v546_v58 = vsub.f32 %v539_v52, %v545_v57 }
 0x2c6   : > { %547 = vst [vmem:[%s1332_s29] sm:$0xff] %v546_v58 }
 0x2c7 PF: > { %s705_s19 = sshll.u32 %s1152_s25, 7  ;;  %s567_s14 = sshll.u32 %s1332_s29, 4  ;;  %s568_s14 = int_to_ptr.vmem [resolvable:$true] %s567_s14 }
 0x2c8   : > { %s1346_s20 = scalar_lea.hbm %s1411_s5, %s705_s19  ;;  %s554_s26 = scalar_lea.sflag [#allocation5], %s1314_s30 }
 0x2c9   : > { %s981_s17 = scalar_lea.vmem %s568_s14, 128  ;;  %s1094_s8 = smov [#allocation11]  }
 0x2ca   : > { %p982_p9 = scmp.ne.s32.totalorder %s568_s14, %s981_s17  ;;  %s985_s10 = sshll.u32 %s1094_s8, 4  ;;  %s986_s10 = int_to_ptr.vmem [resolvable:$false] %s985_s10 }
 0x2cb   : > { %s987_s15 = scalar_lea.vmem %s986_s10, 256  ;;  %p988_p10 = scmp.lt.s32.totalorder %s568_s14, %s986_s10 }
 0x2cc   : > { %p983_p3 = pnand %p982_p9, %p1269_p6  ;;  %p989_p13 = scmp.lt.s32.totalorder %s987_s15, %s981_s17 }
 0x2ce   : > { %p984_p7 = pneg %p983_p3  ;;  %p990_p5 = por %p989_p13, %p988_p10 }
 0x2d0   : > { %p991_p0 = pnand %p990_p5, %p984_p7 }
 0x2d2   : > { %994 = shalt.err (!%p991_p0)
}
 0x2d3   : > { %s995_s30 = scalar_lea.hbm %s1346_s20, 128  ;;  %s999_s27 = scalar_lea.hbm %s1411_s5, 1024 }
 0x2d4   : > { %p996_p11 = scmp.ne.s32.totalorder %s1346_s20, %s995_s30  ;;  %p1000_p2 = scmp.lt.u32.totalorder %s1346_s20, %s1411_s5 }
 0x2d5   : > { %p1001_p1 = scmp.lt.u32.totalorder %s999_s27, %s995_s30  ;;  %p1003_p9 = scmp.lt.u32.totalorder %s995_s30, %s1346_s20 }
 0x2d6   : > { %p997_p8 = pnand %p996_p11, %p1269_p6 }
 0x2d7   : > { %p1002_p4 = por %p1001_p1, %p1000_p2 }
 0x2d8   : > { %p998_p12 = pneg %p997_p8 }
 0x2d9   : > { %p1004_p3 = por %p1003_p9, %p1002_p4 }
 0x2db   : > { %p1005_p7 = pnand %p1004_p3, %p998_p12 }
 0x2dd   : > { %1008 = shalt.err (!%p1005_p7)
}
 0x2de   : > { %790 = dma.vmem_to_hbm [thread:$0]  (%p1269_p6), %s568_s14, 128, %s1346_s20, %s554_s26  }
 0x2df   : > { %s1095_s7 = smov [#allocation12]   ;;  %p1431_p13 = scmp.eq.s32.totalorder %s1152_s25, 7 }
 0x2e0   : > { %s578_s9 = sshll.u32 %s1095_s7, 4  ;;  %s579_s9 = int_to_ptr.vmem [resolvable:$true] %s578_s9 }
 0x2e1   : > { %s1009_s17 = scalar_lea.vmem %s579_s9, 128  ;;  %p1016_p11 = scmp.lt.s32.totalorder %s579_s9, %s579_s9 }
 0x2e2   : > { %p1010_p10 = scmp.ne.s32.totalorder %s579_s9, %s1009_s17  ;;  %p1017_p8 = scmp.lt.s32.totalorder %s1009_s17, %s1009_s17 }
 0x2e4   : > { %p1011_p5 = pnand %p1010_p10, %p1431_p13  ;;  %p1018_p2 = por %p1017_p8, %p1016_p11 }
 0x2e6   : > { %p1012_p0 = pneg %p1011_p5 }
 0x2e8   : > { %p1019_p1 = pnand %p1018_p2, %p1012_p0 }
 0x2ea   : > { %1022 = shalt.err (!%p1019_p1)
}
 0x2eb   : > { %s1023_s13 = scalar_lea.hbm %s1412_s6, 128  ;;  %p1432_p12 = pmov %p1431_p13 }
 0x2ec   : > { %p1024_p6 = scmp.ne.s32.totalorder %s1412_s6, %s1023_s13  ;;  %p1029_p3 = scmp.lt.u32.totalorder %s1023_s13, %s1412_s6 }
 0x2ee   : > { %p1025_p4 = pnand %p1024_p6, %p1432_p12 }
 0x2f0   : > { %p1026_p9 = pneg %p1025_p4 }
 0x2f2   : > { %p1031_p7 = pnand %p1029_p3, %p1026_p9 }
 0x2f4   : > { %1034 = shalt.err (!%p1031_p7)
}
 0x2f5   : > { %p1433_p10 = pmov %p1432_p12 }
 0x2f7   : > { %792 = dma.vmem_to_hbm [thread:$0]  (%p1433_p10), %s579_s9, 128, %s1412_s6, [#allocation13]  }
 0x2f8   : > { %p1434_p13 = pmov %p1433_p10 }
 0x2f9   : > { %p1435_p5 = pmov %p1433_p10 }
 0x2fa   : > { %1064 = dma.done.wait (%p1434_p13), [#allocation13], 128  }
 0x2fb   : > { %1066 = vsyncadd (%p1435_p5), [#allocation13], 4294967168 }
 0x2fc PF: > { %p823_p0 = scmp.ge.s32.totalorder %s1085_s24, 2  ;;  %s594_s29 = sand.u32 1, %s1073_s21  }
 0x2fd   : > { %p1436_p11 = scmp.ne.s32.totalorder %s1417_s28, 0  ;;  %s595_s27 = scalar_lea.sflag [#allocation5], %s594_s29 }
 0x2ff   : > { %p811_p8 = pnand %p823_p0, %p1436_p11 }
 0x301   : > { %1068 = dma.done.wait (!%p811_p8), %s595_s27, 128  }
 0x302   : > { %1070 = vsyncadd (!%p811_p8), %s595_s27, 4294967168  ;;  %p23_p2 = scmp.ge.s32.totalorder %s1255_s18, 10   ;;  %s1437_s21 = smov %s1077_s22 }
 0x303   : > { %s1438_s22 = smov %s1081_s23  ;;  %s1439_s23 = smov %s1265_s11 }
 0x304   : > { %s1440_s24 = smov %s1255_s18  ;;  %25 = sbr.rel (!%p23_p2) target bundleno = 8 (0x8), region = 113 }
 0x30b   :  { %600 = vsyncpa [#allocation4], 1 }
 0x30c   :  { %602 = vsyncpa [#allocation4 + $0x1], 1 }
 0x30d   :  { %603 = vsyncpa [#allocation7], 1 }
 0x30e   :  { %604 = vsyncpa [#allocation10], 1 }
 0x30f   :  { %605 = vsyncpa [#allocation5], 1 }
 0x310   :  { %607 = vsyncpa [#allocation5 + $0x1], 1 }
 0x311   :  { %608 = vsyncpa [#allocation13], 1 }

</bundles_post_ra>
